<compile_context>
chip_gen: v7x
topology: tpu7x:2x2x1
jax: 0.10.0
libtpu: 0.0.40
codegen_flags: <defaults>
</compile_context>

<pallas_src>
import functools

import jax
import jax.numpy as jnp
from jax import lax
from jax.experimental import pallas as pl
from jax.experimental.pallas import tpu as pltpu


def _round_up(a, b):
    return ((a + b - 1) // b) * b


def _vmem_budget_bytes():
    # Generation-aware VMEM budget (v5e/v6e: 128 MiB, v7x: 64 MiB per TC).
    try:
        return int(pltpu.get_tpu_info().vmem_capacity_bytes) * 3 // 4
    except Exception:  # interpret mode / CPU / older jax
        return 48 * 1024 * 1024


# ---------------------------------------------------------------------------
# Pallas kernel: per-class masked Grams, accumulated over sample tiles
# ---------------------------------------------------------------------------
def _class_gram_kernel(y_ref, x_ref, out_ref, xm_ref, *,
                       k_per_group, p_pad, tile_m, m):
    # y_ref  : (tile_m, 1)         int32  labels for this sample tile
    # x_ref  : (tile_m, p_pad)     f32    X tile (feature dim padded to 128)
    # out_ref: (p_pad, kg*p_pad)   f32    resident accumulator for this class group
    # xm_ref : (tile_m, kg*p_pad)  f32    VMEM scratch: lane-dense masked RHS slab
    g = pl.program_id(0)   # class-group axis ("parallel": 2nd TC on v7x)
    i = pl.program_id(1)   # sample-tile axis ("arbitrary": reduction)

    @pl.when(i == 0)
    def _():
        out_ref[...] = jnp.zeros_like(out_ref)

    y = y_ref[...]
    x = x_ref[...]
    zero = jnp.zeros((), dtype=x.dtype)

    # Tail-row masking is only needed when tile_m does not divide m (static
    # Python decision: the common path pays nothing).  Masking X itself zeroes
    # the garbage rows of BOTH matmul operands, so nothing (not even NaN) can
    # leak from the out-of-bounds part of the last tile.
    if m % tile_m != 0:
        row = lax.broadcasted_iota(jnp.int32, (tile_m, 1), 0) + i * tile_m
        x = jnp.where(row < m, x, zero)

    # Build the lane-dense masked RHS slab: column block jj holds Pi_{base+jj} @ X.
    # Masks come from a VPU compare on the int32 labels (free filler under the
    # MXU); every class block is a full-width, 128-aligned store.
    base = g * k_per_group
    for jj in range(k_per_group):                      # static unroll (kg is small)
        xm_ref[:, jj * p_pad:(jj + 1) * p_pad] = jnp.where(y == base + jj, x, zero)

    # Single MXU contraction over the sample axis of both operands:
    #   (tile_m, p_pad)^T . (tile_m, kg*p_pad) -> (p_pad, kg*p_pad), f32 accumulate.
    out_ref[...] += lax.dot_general(
        x, xm_ref[...],
        dimension_numbers=(((0,), (0,)), ((), ())),
        preferred_element_type=jnp.float32,
    )


def compute_class_grams(x, y, num_classes, *, tile_m_max=2048):
    """x: (m, p) f32, y: (m,) int labels in [0, k) -> (k, p, p) f32 Grams
    G_j = X^T diag(1[y==j]) X  (== W @ Pi_j @ W^T in the PyTorch layout)."""
    m, p = x.shape
    k = int(num_classes)

    # Pad the feature dim to a lane multiple so every per-class column block of
    # the slab / output is 128-aligned (unmasked full-width stores).
    p_pad = _round_up(max(p, 1), 128)
    if p_pad != p:
        x = jnp.pad(x, ((0, 0), (0, p_pad - p)))
    x = x.astype(jnp.float32)
    y2 = y.reshape(m, 1).astype(jnp.int32)

    budget = _vmem_budget_bytes()

    # Split classes into groups -> leading "parallel" grid axis.  >=2 groups
    # engages both TensorCores on v7x and caps the resident accumulator +
    # slab scratch at (k / n_groups) * p_pad^2 per step.
    def _acc_bytes(kg):
        return 2 * p_pad * kg * p_pad * 4          # f32 acc, counted double-buffered
    n_groups = k
    for d in [d for d in range(1, k + 1) if k % d == 0]:
        if (d >= 2 or k == 1) and _acc_bytes(k // d) <= budget // 2:
            n_groups = d
            break
    k_per_group = k // n_groups

    # Largest sample tile that keeps acc + slab + double-buffered inputs within
    # the VMEM budget (8-row aligned for the sublane constraint).
    def _vmem_need(tm):
        slab = tm * k_per_group * p_pad * 4
        xin = 2 * (tm * p_pad * 4 + tm * 4)
        return _acc_bytes(k_per_group) + slab + xin
    tile_m = min(_round_up(tile_m_max, 8), _round_up(m, 8))
    while tile_m > 8 and _vmem_need(tile_m) > budget:
        tile_m = max(8, _round_up(tile_m // 2, 8))
    grid_m = pl.cdiv(m, tile_m)

    vmem_limit = int(min(max(2 * _vmem_need(tile_m), 32 * 1024 * 1024),
                         max(budget, 32 * 1024 * 1024)))

    kernel = functools.partial(_class_gram_kernel, k_per_group=k_per_group,
                               p_pad=p_pad, tile_m=tile_m, m=m)
    out = pl.pallas_call(
        kernel,
        out_shape=jax.ShapeDtypeStruct((p_pad, k * p_pad), jnp.float32),
        grid=(n_groups, grid_m),
        in_specs=[
            pl.BlockSpec((tile_m, 1), lambda g, i: (i, 0)),        # labels
            pl.BlockSpec((tile_m, p_pad), lambda g, i: (i, 0)),    # X tile (f32)
        ],
        out_specs=pl.BlockSpec((p_pad, k_per_group * p_pad), lambda g, i: (0, g)),
        scratch_shapes=[pltpu.VMEM((tile_m, k_per_group * p_pad), jnp.float32)],
        compiler_params=pltpu.CompilerParams(
            dimension_semantics=("parallel", "arbitrary"),
            vmem_limit_bytes=vmem_limit,
        ),
    )(y2, x)

    # (p_pad, k*p_pad) slab -> (k, p, p); strip the feature padding.  Each G_j
    # is symmetric, so X^T (Pi_j X) equals W Pi_j W^T from the PyTorch code.
    return out.reshape(p_pad, k, p_pad).transpose(1, 0, 2)[:, :p, :p]


# ---------------------------------------------------------------------------
# MaximalCodingRateReduction forward (glue in plain JAX)
# ---------------------------------------------------------------------------
def _logdet_spd(a):
    # TODO(synk): logdet (Cholesky factorization) has no clean Pallas TPU
    # primitive; I + c*G is SPD so use a Cholesky-based logdet in the glue.
    chol = jnp.linalg.cholesky(a)
    return 2.0 * jnp.sum(jnp.log(jnp.diagonal(chol, axis1=-2, axis2=-1)), axis=-1)


@functools.partial(jax.jit, static_argnames=("num_classes",))
def mcr2_forward(X, Y, num_classes, gam1=1.0, gam2=1.0, eps=0.5, lmb=0.001):
    """Returns (total_loss_empi, (d_empi, c_empi), (d_theo, c_theo))."""
    m, p = X.shape
    k = num_classes

    # Hot path: all k class Grams in one Pallas kernel.
    G_cls = compute_class_grams(X, Y, k)             # (k, p, p)
    # Labels in [0, k) partition the samples, so W @ W.T == sum_j W Pi_j W.T
    # and ||X||_F^2 == trace(G_full): no extra HBM pass over X in the glue.
    G_full = jnp.sum(G_cls, axis=0)                  # (p, p)
    reg_norm_square = jnp.trace(G_full)

    I = jnp.eye(p, dtype=jnp.float32)
    scalar_d = p / (m * eps)
    discrimn_empi = _logdet_spd(I + gam1 * scalar_d * G_full) / 2.0
    discrimn_theo = _logdet_spd(I + scalar_d * G_full) / 2.0

    # trace(Pi_j) == number of samples with label j.
    trPi = jnp.sum(jax.nn.one_hot(Y, k, dtype=jnp.float32), axis=0) + 1e-08

    def _cls_logdet(G, tr):
        return _logdet_spd(I + (p / (tr * eps)) * G)

    logdets = jax.vmap(_cls_logdet)(G_cls, trPi)     # (k,)
    compress_empi = jnp.sum(logdets * trPi / m) / 2.0
    compress_theo = jnp.sum(trPi / (2.0 * m) * logdets)

    total_loss_empi = (gam2 * -discrimn_empi
                       + compress_empi
                       + lmb * reg_norm_square)
    return (total_loss_empi,
            (discrimn_empi, compress_empi),
            (discrimn_theo, compress_theo))


if __name__ == "__main__":
    key = jax.random.PRNGKey(0)
    kx, ky = jax.random.split(key)

    # Small, forward-consistent shapes: m=64 samples, p=32 features, 4 classes.
    m, p, num_classes = 64, 32, 4
    X = jax.random.normal(kx, (m, p), dtype=jnp.float32)
    X = X / jnp.linalg.norm(X, axis=1, keepdims=True)   # unit-norm rows (MCR^2 convention)
    Y = jax.random.randint(ky, (m,), 0, num_classes)

    # Sanity-check the Pallas Grams against a pure-JAX reference (all f32 now).
    grams = compute_class_grams(X, Y, num_classes)
    onehot = jax.nn.one_hot(Y, num_classes, dtype=jnp.float32)
    ref = jnp.einsum("mk,mp,mq->kpq", onehot, X, X)
    assert jnp.allclose(grams, ref, atol=1e-4, rtol=1e-4), "Gram mismatch"

    total, (d_empi, c_empi), (d_theo, c_theo) = mcr2_forward(X, Y, num_classes)
    jax.block_until_ready(total)
    print("KERNEL_OK")
</pallas_src>

<mosaic_0001>
module attributes {stable_mosaic.version = 11 : i64} {
  func.func @_class_gram_kernel(%arg0: i32, %arg1: i32, %arg2: memref<64x1xi32, #tpu.memory_space<vmem>>, %arg3: memref<64x128xf32, #tpu.memory_space<vmem>>, %arg4: memref<128x256xf32, #tpu.memory_space<vmem>>, %arg5: memref<64x256xf32, #tpu.memory_space<vmem>>) attributes {dimension_semantics = [#tpu.dimension_semantics<parallel>, #tpu.dimension_semantics<arbitrary>], iteration_bounds = array<i64: 2, 1>, scalar_prefetch = 0 : i64, scratch_operands = 1 : i64, tpu.core_type = #tpu.core_type<tc>, window_params = [{transform_indices = @transform_0, window_bounds = array<i64: 64, 1>}, {transform_indices = @transform_1, window_bounds = array<i64: 64, 128>}, {transform_indices = @transform_2, window_bounds = array<i64: 128, 256>}]} {
    %c0_i32 = arith.constant 0 : i32
    %0 = arith.cmpi eq, %arg1, %c0_i32 : i32
    %1 = arith.extui %0 : i1 to i32
    %c0_i32_0 = arith.constant 0 : i32
    %2 = arith.cmpi ne, %1, %c0_i32_0 : i32
    scf.if %2 {
      %cst_16 = arith.constant 0.000000e+00 : f32
      %27 = vector.broadcast %cst_16 : f32 to vector<128x256xf32>
      %c0_17 = arith.constant 0 : index
      %c0_18 = arith.constant 0 : index
      %28 = vector.load %arg4[%c0_17, %c0_18] : memref<128x256xf32, #tpu.memory_space<vmem>>, vector<128x256xf32>
      tpu.vector_store %arg4[%c0_17, %c0_18], %27 {strides = array<i32>} : memref<128x256xf32, #tpu.memory_space<vmem>>, vector<128x256xf32>,
    } else {
    }
    %c0 = arith.constant 0 : index
    %c0_1 = arith.constant 0 : index
    %3 = vector.load %arg2[%c0, %c0_1] : memref<64x1xi32, #tpu.memory_space<vmem>>, vector<64x1xi32>
    %c0_2 = arith.constant 0 : index
    %c0_3 = arith.constant 0 : index
    %4 = vector.load %arg3[%c0_2, %c0_3] : memref<64x128xf32, #tpu.memory_space<vmem>>, vector<64x128xf32>
    %c2_i32 = arith.constant 2 : i32
    %5 = arith.muli %arg0, %c2_i32 : i32
    %c0_i32_4 = arith.constant 0 : i32
    %6 = arith.addi %5, %c0_i32_4 : i32
    %7 = vector.broadcast %6 : i32 to vector<64x1xi32>
    %8 = arith.cmpi eq, %3, %7 : vector<64x1xi32>
    %cst = arith.constant 0.000000e+00 : f32
    %9 = vector.shape_cast %8 : vector<64x1xi1> to vector<64x1xi1>
    %10 = vector.broadcast %9 : vector<64x1xi1> to vector<64x128xi1>
    %11 = vector.broadcast %cst : f32 to vector<64x128xf32>
    %12 = arith.select %10, %4, %11 : vector<64x128xi1>, vector<64x128xf32>
    %c0_5 = arith.constant 0 : index
    %c0_6 = arith.constant 0 : index
    %13 = vector.load %arg5[%c0_5, %c0_6] : memref<64x256xf32, #tpu.memory_space<vmem>>, vector<64x128xf32>
    tpu.vector_store %arg5[%c0_5, %c0_6], %12 {strides = array<i32>} : memref<64x256xf32, #tpu.memory_space<vmem>>, vector<64x128xf32>,
    %c1_i32 = arith.constant 1 : i32
    %14 = arith.addi %5, %c1_i32 : i32
    %15 = vector.broadcast %14 : i32 to vector<64x1xi32>
    %16 = arith.cmpi eq, %3, %15 : vector<64x1xi32>
    %cst_7 = arith.constant 0.000000e+00 : f32
    %17 = vector.shape_cast %16 : vector<64x1xi1> to vector<64x1xi1>
    %18 = vector.broadcast %17 : vector<64x1xi1> to vector<64x128xi1>
    %19 = vector.broadcast %cst_7 : f32 to vector<64x128xf32>
    %20 = arith.select %18, %4, %19 : vector<64x128xi1>, vector<64x128xf32>
    %c0_8 = arith.constant 0 : index
    %c128 = arith.constant 128 : index
    %21 = vector.load %arg5[%c0_8, %c128] : memref<64x256xf32, #tpu.memory_space<vmem>>, vector<64x128xf32>
    tpu.vector_store %arg5[%c0_8, %c128], %20 {strides = array<i32>} : memref<64x256xf32, #tpu.memory_space<vmem>>, vector<64x128xf32>,
    %c0_9 = arith.constant 0 : index
    %c0_10 = arith.constant 0 : index
    %22 = vector.load %arg4[%c0_9, %c0_10] : memref<128x256xf32, #tpu.memory_space<vmem>>, vector<128x256xf32>
    %c0_11 = arith.constant 0 : index
    %c0_12 = arith.constant 0 : index
    %23 = vector.load %arg5[%c0_11, %c0_12] : memref<64x256xf32, #tpu.memory_space<vmem>>, vector<64x256xf32>
    %cst_13 = arith.constant dense<0.000000e+00> : vector<128x256xf32>
    %24 = tpu.matmul %4, %23, %cst_13 {dimension_numbers = #tpu.dot_dimension_numbers<[0], [0], [1], [1], [0, 1, 1, 1], [], []>} : vector<64x128xf32>, vector<64x256xf32>, vector<128x256xf32> -> vector<128x256xf32>
    %25 = arith.addf %22, %24 : vector<128x256xf32>
    %c0_14 = arith.constant 0 : index
    %c0_15 = arith.constant 0 : index
    %26 = vector.load %arg4[%c0_14, %c0_15] : memref<128x256xf32, #tpu.memory_space<vmem>>, vector<128x256xf32>
    tpu.vector_store %arg4[%c0_14, %c0_15], %25 {strides = array<i32>} : memref<128x256xf32, #tpu.memory_space<vmem>>, vector<128x256xf32>,
    return
  }
  func.func @transform_0(%arg0: i32, %arg1: i32) -> (i32, i32) {
    %c0_i32 = arith.constant 0 : i32
    %c0_i32_0 = arith.constant 0 : i32
    return %arg1, %c0_i32 : i32, i32
  }
  func.func @transform_1(%arg0: i32, %arg1: i32) -> (i32, i32) {
    %c0_i32 = arith.constant 0 : i32
    %c0_i32_0 = arith.constant 0 : i32
    return %arg1, %c0_i32 : i32, i32
  }
  func.func @transform_2(%arg0: i32, %arg1: i32) -> (i32, i32) {
    %c0_i32 = arith.constant 0 : i32
    %c0_i32_0 = arith.constant 0 : i32
    return %c0_i32, %arg0 : i32, i32
  }
}

</mosaic_0001>

<bundles_post_ra>
// kernel: tpu_custom_call.1
= control target key start
LH: loop header
LB: loop body
LE: loop exit
PB: predicated region body
PF: predicated region fallthrough
CT: control target
= control target key end

     0   :  { %7 = vsyncpa [#allocation4], 0  ;;  %s1296_s0 = inlined_call_operand.vmem [shape: s32[64,1], index: 0, kind: input, shape index: {}]   ;;  %s1297_s1 = inlined_call_operand.vmem [shape: f32[64,128], index: 1, kind: input, shape index: {}]   ;;  %s1298_s2 = inlined_call_operand.hbm [shape: f32[128,512], index: 2, kind: output, shape index: {}]  }
   0x1   :  { %9 = vsyncpa [#allocation4 + $0x1], 0  ;;  %s1060_s9 = smov 0   ;;  %s1062_s10 = smov 0  }
   0x2   :  { %s1064_s11 = smov 0   ;;  %s1066_s12 = smov 0  }
   0x3   :  { %s1068_s13 = smov 0   ;;  %s1070_s14 = smov 0  }
   0x4 LB: > { %s819_s15 = sadd.s32 4294967295, %s1037_s14   ;;  %s820_s16 = sadd.s32 4294967294, %s1037_s14   ;;  %s1037_s14 = sphi %s1070_s14, %s15_s14   ;;  %s1033_s13 = sphi %s1068_s13, %s1305_s13   ;;  %s1029_s12 = sphi %s1066_s12, %s1304_s12   ;;  %s1025_s11 = sphi %s1064_s11, %s1303_s11   ;;  %s1021_s10 = sphi %s1062_s10, %s1302_s10   ;;  %s1017_s9 = sphi %s1060_s9, %s1301_s9  }
   0x5   : > { %s27_s17 = sadd.s32 1, %s1033_s13  ;;  %s86_s18 = sadd.s32 1, %s1025_s11 }
   0x6   : > { %p29_p0 = scmp.ge.s32.totalorder %s27_s17, 2  ;;  %p96_p1 = scmp.ne.s32.totalorder %s1025_s11, %s1021_s10 }
   0x7   : > { %p97_p2 = scmp.eq.s32.totalorder %s819_s15, 1  ;;  %p102_p3 = scmp.ne.s32.totalorder %s1021_s10, %s1017_s9 }
   0x8   : > { %s1307_s17 = smov (%p29_p0, %s27_s17), 0  ;;  %p103_p5 = scmp.eq.s32.totalorder %s820_s16, 1 }
   0x9   : > { %p1100_p4 = por %p97_p2, %p96_p1  ;;  %s83_s20 = ssub.s32 %s1033_s13, %s1307_s17 }
   0xa   : > { %p824_p6 = scmp.ge.s32.totalorder %s1037_s14, 1  ;;  %p84_p7 = scmp.eq.s32.totalorder %s83_s20, 0 }
   0xb   : > { %p1107_p8 = por %p103_p5, %p102_p3  ;;  %p139_p9 = scmp.lt.s32.totalorder %s1037_s14, 3 }
   0xc   : > { %s1113_s22 = scalar_select %p84_p7, %s1025_s11, %s86_s18  }
   0xd   : > { %p140_p10 = pnand %p824_p6, %p139_p9 }
   0xe   : > { %v215_v0 = vld [vmem:[%s1296_s0] sm:$0xff] (!%p140_p10)  ;;  %s826_s25 = sshll.u32 (!%p140_p10), %s1029_s12, 1  ;;  %v216_v1 = vld [vmem:[%s1296_s0 + $0x8] sm:$0xff] (!%p140_p10)  ;;  %v1039_v2 = vmov (!%p140_p10), 0   ;;  %v218_v6 = vld [vmem:[%s1296_s0 + $0x18] sm:$0xff] (!%p140_p10)  ;;  %v1040_v30 = vmov (!%p140_p10), 0.0  }
   0xf   : > { %143 = sbr.rel (%p140_p10) target bundleno = 495 (0x1ef), region = 28  ;;  %958 = vset.pattern.permute.xlu0 (!%p140_p10), %v1039_v2  ;;  %957 = vset.pattern.permute.xlu1 (!%p140_p10), %v1039_v2  ;;  %s297_s28 = sadd.s32 (!%p140_p10), 1, %s826_s25  ;;  %v232_v3 = vstv (!%p140_p10), %s826_s25  ;;  %v217_v8 = vld [vmem:[%s1296_s0 + $0x10] sm:$0xff] (!%p140_p10)  ;;  %v223_v12 = vld [vmem:[%s1297_s1] sm:$0xff] (!%p140_p10)  ;;  %v224_v13 = vld [vmem:[%s1297_s1 + $0x8] sm:$0xff] (!%p140_p10) }
  0x10   : > { %v298_v4 = vstv (!%p140_p10), %s297_s28  ;;  %vm233_vm0 = vcmp.eq.s32.totalorder (!%p140_p10), %v215_v0, %v232_v3  ;;  %vm234_vm1 = vcmp.eq.s32.totalorder (!%p140_p10), %v216_v1, %v232_v3  ;;  %vm236_vm6 = vcmp.eq.s32.totalorder (!%p140_p10), %v218_v6, %v232_v3  ;;  %v220_v16 = vld [vmem:[%s1296_s0 + $0x28] sm:$0xff] (!%p140_p10)  ;;  %v219_v17 = vld [vmem:[%s1296_s0 + $0x20] sm:$0xff] (!%p140_p10)  ;;  %v222_v22 = vld [vmem:[%s1296_s0 + $0x38] sm:$0xff] (!%p140_p10)  ;;  %556 = vmatprep.mubr.f32.mxu0 (!%p140_p10), %v1040_v30  ;;  %604 = vmatprep.mubr.f32.mxu1 (!%p140_p10), %v1040_v30  ;;  %s163_s18 = sand.u32 (!%p140_p10), 1, %s1021_s10   ;;  %s848_s24 = sshll.u32 (!%p140_p10), %s1029_s12, 8 }
  0x11   : > { %vm299_vm2 = vcmp.eq.s32.totalorder (!%p140_p10), %v215_v0, %v298_v4  ;;  %v241_v5 = vsel (!%p140_p10), %vm233_vm0, 1, %v1039_v2  ;;  %vm300_vm3 = vcmp.eq.s32.totalorder (!%p140_p10), %v216_v1, %v298_v4  ;;  %v242_v9 = vsel (!%p140_p10), %vm234_vm1, 1, %v1039_v2  ;;  %v221_v23 = vld [vmem:[%s1296_s0 + $0x30] sm:$0xff] (!%p140_p10)  ;;  %v226_v32 = vld [vmem:[%s1297_s1 + $0x18] sm:$0xff] (!%p140_p10)  ;;  %v227_v33 = vld [vmem:[%s1297_s1 + $0x20] sm:$0xff] (!%p140_p10)  ;;  %s825_s20 = sshll.u32 (!%p140_p10), %s163_s18, 8  ;;  %s1242_s28 = scalar_lea.hbm (!%p140_p10), %s1298_s2, %s848_s24 }
  0x12   : > { %v307_v7 = vsel (!%p140_p10), %vm299_vm2, 1, %v1039_v2  ;;  %250 = vperm.xlu1 (!%p140_p10), %957, %v241_v5   ;;  %v308_v10 = vsel (!%p140_p10), %vm300_vm3, 1, %v1039_v2  ;;  %vm302_vm4 = vcmp.eq.s32.totalorder (!%p140_p10), %v218_v6, %v298_v4  ;;  %vm301_vm5 = vcmp.eq.s32.totalorder (!%p140_p10), %v217_v8, %v298_v4  ;;  %v225_v31 = vld [vmem:[%s1297_s1 + $0x10] sm:$0xff] (!%p140_p10)  ;;  %v228_v34 = vld [vmem:[%s1297_s1 + $0x28] sm:$0xff] (!%p140_p10)  ;;  %v230_v36 = vld [vmem:[%s1297_s1 + $0x38] sm:$0xff] (!%p140_p10)  ;;  %s1205_s23 = scalar_lea.vmem (!%p140_p10), [#allocation3], %s825_s20 }
  0x13   : > { %316 = vperm.xlu0 (!%p140_p10), %958, %v307_v7   ;;  %v310_v11 = vsel (!%p140_p10), %vm302_vm4, 1, %v1039_v2  ;;  %v309_v14 = vsel (!%p140_p10), %vm301_vm5, 1, %v1039_v2  ;;  %v1134_v15 = vpack.c.bf16 (!%p140_p10), %v224_v13, %v223_v12  ;;  %vm235_vm7 = vcmp.eq.s32.totalorder (!%p140_p10), %v217_v8, %v232_v3  ;;  %v229_v35 = vld [vmem:[%s1297_s1 + $0x30] sm:$0xff] (!%p140_p10)  ;;  %s731_s25 = sshll.u32 (!%p140_p10), %s1205_s23, 4  ;;  %s1250_s29 = scalar_lea.sflag (!%p140_p10), [#allocation4], %s163_s18  ;;  %s1244_s25 = int_to_ptr.vmem [resolvable:$true] %s731_s25 }
  0x14   : > { %v244_v18 = vsel (!%p140_p10), %vm236_vm6, 1, %v1039_v2  ;;  %v243_v19 = vsel (!%p140_p10), %vm235_vm7, 1, %v1039_v2  ;;  %vm304_vm8 = vcmp.eq.s32.totalorder (!%p140_p10), %v220_v16, %v298_v4  ;;  %vm303_vm9 = vcmp.eq.s32.totalorder (!%p140_p10), %v219_v17, %v298_v4  ;;  %s959_s12 = scalar_lea.vmem (!%p140_p10), %s1244_s25, 4096  ;;  %s1041_s30 = smov (!%p140_p10), [#allocation3]  }
  0x15   : > { %v312_v20 = vsel (!%p140_p10), %vm304_vm8, 1, %v1039_v2  ;;  %v311_v21 = vsel (!%p140_p10), %vm303_vm9, 1, %v1039_v2  ;;  %vm238_vm10 = vcmp.eq.s32.totalorder (!%p140_p10), %v220_v16, %v232_v3  ;;  %vm237_vm11 = vcmp.eq.s32.totalorder (!%p140_p10), %v219_v17, %v232_v3  ;;  %p960_p11 = scmp.ne.s32.totalorder (!%p140_p10), %s1244_s25, %s959_s12  ;;  %s963_s3 = sshll.u32 (!%p140_p10), %s1041_s30, 4  ;;  %s964_s3 = int_to_ptr.vmem [resolvable:$false] %s963_s3 }
  0x16   : > { %253 = vperm.xlu1 %957, %v242_v9   ;;  %v246_v24 = vsel %vm238_vm10, 1, %v1039_v2  ;;  %v245_v25 = vsel %vm237_vm11, 1, %v1039_v2  ;;  %vm306_vm12 = vcmp.eq.s32.totalorder %v222_v22, %v298_v4  ;;  %vm305_vm13 = vcmp.eq.s32.totalorder %v221_v23, %v298_v4  ;;  %s965_s4 = scalar_lea.vmem %s964_s3, 8192  ;;  %p966_p0 = scmp.lt.s32.totalorder %s1244_s25, %s964_s3 }
  0x17   : > { %319 = vperm.xlu0 %958, %v308_v10   ;;  %v314_v26 = vsel %vm306_vm12, 1, %v1039_v2  ;;  %v313_v27 = vsel %vm305_vm13, 1, %v1039_v2  ;;  %vm240_vm14 = vcmp.eq.s32.totalorder %v222_v22, %v232_v3  ;;  %vm239_vm15 = vcmp.eq.s32.totalorder %v221_v23, %v232_v3  ;;  %p961_p12 = pnand %p960_p11, %p1100_p4  ;;  %p967_p1 = scmp.lt.s32.totalorder %s965_s4, %s959_s12 }
  0x18   : > { %v248_v28 = vsel %vm240_vm14, 1, %v1039_v2  ;;  %v247_v29 = vsel %vm239_vm15, 1, %v1039_v2  ;;  %v871_v41 = vpack.c.bf16 %v226_v32, %v225_v31  ;;  %v877_v46 = vpack.c.bf16 %v228_v34, %v227_v33 }
  0x19   : > { %v883_v51 = vpack.c.bf16 %v230_v36, %v229_v35  ;;  %p962_p13 = pneg %p961_p12  ;;  %p968_p2 = por %p967_p1, %p966_p0 }
  0x1a   : > { %325 = vperm.xlu1 %957, %v310_v11  }
  0x1b   : > { %322 = vperm.xlu0 %958, %v309_v14   ;;  %p969_p3 = pnand %p968_p2, %p962_p13 }
  0x1e   : > { %259 = vperm.xlu1 %957, %v244_v18  }
  0x1f   : > { %256 = vperm.xlu0 %958, %v243_v19  }
  0x22   : > { %331 = vperm.xlu1 %957, %v312_v20  }
  0x23   : > { %328 = vperm.xlu0 %958, %v311_v21  }
  0x26   : > { %265 = vperm.xlu1 %957, %v246_v24  }
  0x27   : > { %262 = vperm.xlu0 %958, %v245_v25  }
  0x2a   : > { %337 = vperm.xlu1 %957, %v314_v26  }
  0x2b   : > { %334 = vperm.xlu0 %958, %v313_v27  }
  0x2e   : > { %271 = vperm.xlu1 %957, %v248_v28  }
  0x2f   : > { %268 = vperm.xlu0 %958, %v247_v29  }
  0x4d   : > { %411 = vxpose.xlu0.b32.start [1/8] (short) %v223_v12, 128 }
  0x51   : > { %412 = vxpose.xlu0.b32.cont [2/8] (short) %v224_v13, 128 }
  0x55   : > { %413 = vxpose.xlu0.b32.cont [3/8] (short) %v225_v31, 128 }
  0x59   : > { %414 = vxpose.xlu0.b32.cont [4/8] (short) %v226_v32, 128 }
  0x5d   : > { %415 = vxpose.xlu0.b32.cont [5/8] (short) %v227_v33, 128 }
  0x61   : > { %416 = vxpose.xlu0.b32.cont [6/8] (short) %v228_v34, 128 }
  0x65   : > { %417 = vxpose.xlu0.b32.cont [7/8] (short) %v229_v35, 128 }
  0x69   : > { %418 = vxpose.xlu0.b32.end [8/8] (short) %v230_v36, 128 }
  0x91   : > { %v251_v37 = vpop.permute.xlu1 %250 }
  0x92   : > { %v317_v38 = vpop.permute.xlu0 %316  ;;  %vm273_vm0 = vcmp.eq.s32.totalorder %v251_v37, 1 }
  0x93   : > { %vm339_vm2 = vcmp.eq.s32.totalorder %v317_v38, 1 }
  0x95   : > { %v254_v39 = vpop.permute.xlu1 %253 }
  0x96   : > { %v320_v40 = vpop.permute.xlu0 %319  ;;  %vm274_vm1 = vcmp.eq.s32.totalorder %v254_v39, 1 }
  0x97   : > { %vm340_vm3 = vcmp.eq.s32.totalorder %v320_v40, 1  ;;  %vm869_vm4 = vmpackc.low %vm274_vm1, %vm273_vm0 }
  0x98   : > { %vm866_vm5 = vmpackc.low %vm340_vm3, %vm339_vm2 }
  0x99   : > { %867 = vmatprep.subr.msk.bf16.mxu0 %vm866_vm5, %v1134_v15  ;;  %889 = vmatprep.subr.msk.bf16.mxu1 %vm866_vm5, %v1134_v15  ;;  %v326_v42 = vpop.permute.xlu1 %325 }
  0x9a   : > { %v323_v43 = vpop.permute.xlu0 %322  ;;  %vm342_vm6 = vcmp.eq.s32.totalorder %v326_v42, 1  ;;  %870 = vmatpush1.bf16.msk.msra.mxu0 %vm869_vm4, %v1134_v15  ;;  %893 = vmatpush1.bf16.msk.msra.mxu1 %vm869_vm4, %v1134_v15 }
  0x9b   : > { %vm341_vm7 = vcmp.eq.s32.totalorder %v323_v43, 1 }
  0x9c   : > { %vm872_vm8 = vmpackc.low %vm342_vm6, %vm341_vm7 }
  0x9d   : > { %873 = vmatprep.subr.msk.bf16.mxu0 %vm872_vm8, %v871_v41  ;;  %890 = vmatprep.subr.msk.bf16.mxu1 %vm872_vm8, %v871_v41  ;;  %v260_v44 = vpop.permute.xlu1 %259  ;;  %vm443_vm8 = vcmask 523264  }
  0x9e   : > { %v257_v45 = vpop.permute.xlu0 %256  ;;  %vm276_vm9 = vcmp.eq.s32.totalorder %v260_v44, 1 }
  0x9f   : > { %vm275_vm10 = vcmp.eq.s32.totalorder %v257_v45, 1 }
  0xa0   : > { %vm875_vm11 = vmpackc.low %vm276_vm9, %vm275_vm10 }
  0xa1   : > { %876 = vmatpush1.bf16.msk.msra.mxu0 %vm875_vm11, %v871_v41  ;;  %894 = vmatpush1.bf16.msk.msra.mxu1 %vm875_vm11, %v871_v41  ;;  %v332_v47 = vpop.permute.xlu1 %331 }
  0xa2   : > { %v329_v48 = vpop.permute.xlu0 %328  ;;  %vm344_vm12 = vcmp.eq.s32.totalorder %v332_v47, 1 }
  0xa3   : > { %vm343_vm13 = vcmp.eq.s32.totalorder %v329_v48, 1 }
  0xa4   : > { %vm878_vm14 = vmpackc.low %vm344_vm12, %vm343_vm13 }
  0xa5   : > { %879 = vmatprep.subr.msk.bf16.mxu0 %vm878_vm14, %v877_v46  ;;  %891 = vmatprep.subr.msk.bf16.mxu1 %vm878_vm14, %v877_v46  ;;  %v266_v49 = vpop.permute.xlu1 %265 }
  0xa6   : > { %v263_v50 = vpop.permute.xlu0 %262  ;;  %vm278_vm15 = vcmp.eq.s32.totalorder %v266_v49, 1 }
  0xa7   : > { %vm277_vm0 = vcmp.eq.s32.totalorder %v263_v50, 1 }
  0xa8   : > { %vm881_vm1 = vmpackc.low %vm278_vm15, %vm277_vm0 }
  0xa9   : > { %882 = vmatpush1.bf16.msk.msra.mxu0 %vm881_vm1, %v877_v46  ;;  %895 = vmatpush1.bf16.msk.msra.mxu1 %vm881_vm1, %v877_v46  ;;  %v338_v52 = vpop.permute.xlu1 %337 }
  0xaa   : > { %v335_v53 = vpop.permute.xlu0 %334  ;;  %vm346_vm2 = vcmp.eq.s32.totalorder %v338_v52, 1 }
  0xab   : > { %vm345_vm3 = vcmp.eq.s32.totalorder %v335_v53, 1 }
  0xac   : > { %vm884_vm4 = vmpackc.low %vm346_vm2, %vm345_vm3 }
  0xad   : > { %885 = vmatprep.subr.msk.bf16.mxu0 %vm884_vm4, %v883_v51  ;;  %892 = vmatprep.subr.msk.bf16.mxu1 %vm884_vm4, %v883_v51  ;;  %v272_v54 = vpop.permute.xlu1 %271 }
  0xae   : > { %v269_v55 = vpop.permute.xlu0 %268  ;;  %vm280_vm5 = vcmp.eq.s32.totalorder %v272_v54, 1 }
  0xaf   : > { %vm279_vm6 = vcmp.eq.s32.totalorder %v269_v55, 1 }
  0xb0   : > { %vm887_vm7 = vmpackc.low %vm280_vm5, %vm279_vm6 }
  0xb1   : > { %888 = vmatpush1.bf16.msk.msra.mxu0 %vm887_vm7, %v883_v51  ;;  %896 = vmatpush1.bf16.msk.msra.mxu1 %vm887_vm7, %v883_v51 }
  0xcd   : > { %v427_v56 = vpop.trf.xlu0 }
  0xce   : > { %827 = vmatmul.mubr.msk.f32.vlgmr.msra.gmra.mrb[0].mxu0 %vm443_vm8, %v427_v56 }
  0xcf   : > { %562 = vmatprep.mubr.f32.mxu0 %v1040_v30 }
  0xd1   : > { %v428_v57 = vpop.trf.xlu0 }
  0xd2   : > { %828 = vmatmul.mubr.msk.f32.gmra.mrb[2].mxu0 %vm443_vm8, %v428_v57 }
  0xd3   : > { %568 = vmatprep.mubr.f32.mxu0 %v1040_v30 }
  0xd5   : > { %v429_v58 = vpop.trf.xlu0 }
  0xd6   : > { %829 = vmatmul.mubr.msk.f32.gmra.mrb[4].mxu0 %vm443_vm8, %v429_v58 }
  0xd7   : > { %574 = vmatprep.mubr.f32.mxu0 %v1040_v30 }
  0xd9   : > { %v430_v59 = vpop.trf.xlu0 }
  0xda   : > { %830 = vmatmul.mubr.msk.f32.gmra.mrb[6].mxu0 %vm443_vm8, %v430_v59 }
  0xdb   : > { %580 = vmatprep.mubr.f32.mxu0 %v1040_v30 }
  0xdd   : > { %v431_v60 = vpop.trf.xlu0 }
  0xde   : > { %831 = vmatmul.mubr.msk.f32.gmra.mrb[8].mxu0 %vm443_vm8, %v431_v60 }
  0xdf   : > { %586 = vmatprep.mubr.f32.mxu0 %v1040_v30 }
  0xe1   : > { %v432_v61 = vpop.trf.xlu0 }
  0xe2   : > { %832 = vmatmul.mubr.msk.f32.gmra.mrb[10].mxu0 %vm443_vm8, %v432_v61 }
  0xe3   : > { %592 = vmatprep.mubr.f32.mxu0 %v1040_v30 }
  0xe5   : > { %v433_v62 = vpop.trf.xlu0 }
  0xe6   : > { %833 = vmatmul.mubr.msk.f32.gmra.mrb[12].mxu0 %vm443_vm8, %v433_v62 }
  0xe7   : > { %598 = vmatprep.mubr.f32.mxu0 %v1040_v30 }
  0xe9   : > { %v434_v63 = vpop.trf.xlu0 }
  0xea   : > { %834 = vmatmul.mubr.msk.f32.gmra.mrb[14].mxu0 %vm443_vm8, %v434_v63 }
  0xed   : > { %v435_v0 = vpop.trf.xlu0 }
  0xee   : > { %835 = vmatmul.mubr.msk.f32.vlgmr.msra.gmra.mrb[0].mxu1 %vm443_vm8, %v435_v0 }
  0xef   : > { %610 = vmatprep.mubr.f32.mxu1 %v1040_v30 }
  0xf1   : > { %v436_v1 = vpop.trf.xlu0 }
  0xf2   : > { %836 = vmatmul.mubr.msk.f32.gmra.mrb[2].mxu1 %vm443_vm8, %v436_v1 }
  0xf3   : > { %616 = vmatprep.mubr.f32.mxu1 %v1040_v30 }
  0xf5   : > { %v437_v2 = vpop.trf.xlu0 }
  0xf6   : > { %837 = vmatmul.mubr.msk.f32.gmra.mrb[4].mxu1 %vm443_vm8, %v437_v2 }
  0xf7   : > { %622 = vmatprep.mubr.f32.mxu1 %v1040_v30 }
  0xf9   : > { %v438_v3 = vpop.trf.xlu0 }
  0xfa   : > { %838 = vmatmul.mubr.msk.f32.gmra.mrb[6].mxu1 %vm443_vm8, %v438_v3 }
  0xfb   : > { %628 = vmatprep.mubr.f32.mxu1 %v1040_v30 }
  0xfd   : > { %v439_v4 = vpop.trf.xlu0 }
  0xfe   : > { %839 = vmatmul.mubr.msk.f32.gmra.mrb[8].mxu1 %vm443_vm8, %v439_v4 }
  0xff   : > { %634 = vmatprep.mubr.f32.mxu1 %v1040_v30 }
 0x101   : > { %v440_v5 = vpop.trf.xlu0 }
 0x102   : > { %840 = vmatmul.mubr.msk.f32.gmra.mrb[10].mxu1 %vm443_vm8, %v440_v5 }
 0x103   : > { %640 = vmatprep.mubr.f32.mxu1 %v1040_v30 }
 0x105   : > { %v441_v6 = vpop.trf.xlu0 }
 0x106   : > { %841 = vmatmul.mubr.msk.f32.gmra.mrb[12].mxu1 %vm443_vm8, %v441_v6 }
 0x107   : > { %646 = vmatprep.mubr.f32.mxu1 %v1040_v30 }
 0x109   : > { %v442_v7 = vpop.trf.xlu0 }
 0x10a   : > { %842 = vmatmul.mubr.msk.f32.gmra.mrb[14].mxu1 %vm443_vm8, %v442_v7 }
 0x1a1   : > { %v558_v8 = vpop.f32.mrb[0].mxu0 }
 0x1a2   : > { %v560_v9 = vpop.f32.mrb[1].mxu0  ;;  %685 = vst [vmem:[%s1205_s23] sm:$0xff] %v558_v8 }
 0x1a3   : > { %686 = vst [vmem:[%s1205_s23 + $0x8] sm:$0xff] %v560_v9 }
 0x1a5   : > { %v564_v10 = vpop.f32.mrb[2].mxu0 }
 0x1a6   : > { %v566_v11 = vpop.f32.mrb[3].mxu0  ;;  %687 = vst [vmem:[%s1205_s23 + $0x10] sm:$0xff] %v564_v10 }
 0x1a7   : > { %688 = vst [vmem:[%s1205_s23 + $0x18] sm:$0xff] %v566_v11 }
 0x1a9   : > { %v570_v12 = vpop.f32.mrb[4].mxu0 }
 0x1aa   : > { %v572_v13 = vpop.f32.mrb[5].mxu0  ;;  %689 = vst [vmem:[%s1205_s23 + $0x20] sm:$0xff] %v570_v12 }
 0x1ab   : > { %690 = vst [vmem:[%s1205_s23 + $0x28] sm:$0xff] %v572_v13 }
 0x1ad   : > { %v576_v14 = vpop.f32.mrb[6].mxu0 }
 0x1ae   : > { %v578_v15 = vpop.f32.mrb[7].mxu0  ;;  %691 = vst [vmem:[%s1205_s23 + $0x30] sm:$0xff] %v576_v14 }
 0x1af   : > { %692 = vst [vmem:[%s1205_s23 + $0x38] sm:$0xff] %v578_v15 }
 0x1b1   : > { %v582_v16 = vpop.f32.mrb[8].mxu0 }
 0x1b2   : > { %v584_v17 = vpop.f32.mrb[9].mxu0  ;;  %693 = vst [vmem:[%s1205_s23 + $0x40] sm:$0xff] %v582_v16 }
 0x1b3   : > { %694 = vst [vmem:[%s1205_s23 + $0x48] sm:$0xff] %v584_v17 }
 0x1b5   : > { %v588_v18 = vpop.f32.mrb[10].mxu0 }
 0x1b6   : > { %v590_v19 = vpop.f32.mrb[11].mxu0  ;;  %695 = vst [vmem:[%s1205_s23 + $0x50] sm:$0xff] %v588_v18 }
 0x1b7   : > { %696 = vst [vmem:[%s1205_s23 + $0x58] sm:$0xff] %v590_v19 }
 0x1b9   : > { %v594_v20 = vpop.f32.mrb[12].mxu0 }
 0x1ba   : > { %v596_v21 = vpop.f32.mrb[13].mxu0  ;;  %697 = vst [vmem:[%s1205_s23 + $0x60] sm:$0xff] %v594_v20 }
 0x1bb   : > { %698 = vst [vmem:[%s1205_s23 + $0x68] sm:$0xff] %v596_v21 }
 0x1bd   : > { %v600_v22 = vpop.f32.mrb[14].mxu0 }
 0x1be   : > { %v602_v23 = vpop.f32.mrb[15].mxu0  ;;  %699 = vst [vmem:[%s1205_s23 + $0x70] sm:$0xff] %v600_v22 }
 0x1bf   : > { %700 = vst [vmem:[%s1205_s23 + $0x78] sm:$0xff] %v602_v23 }
 0x1c1   : > { %v606_v24 = vpop.f32.mrb[0].mxu1 }
 0x1c2   : > { %v608_v25 = vpop.f32.mrb[1].mxu1  ;;  %701 = vst [vmem:[%s1205_s23 + $0x80] sm:$0xff] %v606_v24 }
 0x1c3   : > { %702 = vst [vmem:[%s1205_s23 + $0x88] sm:$0xff] %v608_v25 }
 0x1c5   : > { %v612_v26 = vpop.f32.mrb[2].mxu1 }
 0x1c6   : > { %v614_v27 = vpop.f32.mrb[3].mxu1  ;;  %703 = vst [vmem:[%s1205_s23 + $0x90] sm:$0xff] %v612_v26 }
 0x1c7   : > { %704 = vst [vmem:[%s1205_s23 + $0x98] sm:$0xff] %v614_v27 }
 0x1c9   : > { %v618_v28 = vpop.f32.mrb[4].mxu1 }
 0x1ca   : > { %v620_v29 = vpop.f32.mrb[5].mxu1  ;;  %705 = vst [vmem:[%s1205_s23 + $0xa0] sm:$0xff] %v618_v28 }
 0x1cb   : > { %706 = vst [vmem:[%s1205_s23 + $0xa8] sm:$0xff] %v620_v29 }
 0x1cd   : > { %v624_v30 = vpop.f32.mrb[6].mxu1 }
 0x1ce   : > { %v626_v31 = vpop.f32.mrb[7].mxu1  ;;  %707 = vst [vmem:[%s1205_s23 + $0xb0] sm:$0xff] %v624_v30 }
 0x1cf   : > { %708 = vst [vmem:[%s1205_s23 + $0xb8] sm:$0xff] %v626_v31 }
 0x1d1   : > { %v630_v32 = vpop.f32.mrb[8].mxu1 }
 0x1d2   : > { %v632_v33 = vpop.f32.mrb[9].mxu1  ;;  %709 = vst [vmem:[%s1205_s23 + $0xc0] sm:$0xff] %v630_v32 }
 0x1d3   : > { %710 = vst [vmem:[%s1205_s23 + $0xc8] sm:$0xff] %v632_v33 }
 0x1d5   : > { %v636_v34 = vpop.f32.mrb[10].mxu1 }
 0x1d6   : > { %v638_v35 = vpop.f32.mrb[11].mxu1  ;;  %711 = vst [vmem:[%s1205_s23 + $0xd0] sm:$0xff] %v636_v34 }
 0x1d7   : > { %712 = vst [vmem:[%s1205_s23 + $0xd8] sm:$0xff] %v638_v35 }
 0x1d9   : > { %v642_v36 = vpop.f32.mrb[12].mxu1 }
 0x1da   : > { %v644_v37 = vpop.f32.mrb[13].mxu1  ;;  %713 = vst [vmem:[%s1205_s23 + $0xe0] sm:$0xff] %v642_v36 }
 0x1db   : > { %714 = vst [vmem:[%s1205_s23 + $0xe8] sm:$0xff] %v644_v37 }
 0x1dd   : > { %v648_v38 = vpop.f32.mrb[14].mxu1 }
 0x1de   : > { %v650_v39 = vpop.f32.mrb[15].mxu1  ;;  %715 = vst [vmem:[%s1205_s23 + $0xf0] sm:$0xff] %v648_v38 }
 0x1df   : > { %716 = vst [vmem:[%s1205_s23 + $0xf8] sm:$0xff] %v650_v39 }
 0x1e0   : > { %972 = shalt.err (!%p969_p3)
}
 0x1e1   : > { %s973_s5 = scalar_lea.hbm %s1242_s28, 4096  ;;  %s977_s8 = scalar_lea.hbm %s1298_s2, 8192 }
 0x1e2   : > { %p974_p5 = scmp.ne.s32.totalorder %s1242_s28, %s973_s5  ;;  %p978_p9 = scmp.lt.u32.totalorder %s1242_s28, %s1298_s2 }
 0x1e3   : > { %p979_p10 = scmp.lt.u32.totalorder %s977_s8, %s973_s5  ;;  %p981_p12 = scmp.lt.u32.totalorder %s973_s5, %s1242_s28 }
 0x1e4   : > { %p975_p6 = pnand %p974_p5, %p1100_p4 }
 0x1e5   : > { %p980_p11 = por %p979_p10, %p978_p9 }
 0x1e6   : > { %p976_p7 = pneg %p975_p6 }
 0x1e7   : > { %p982_p13 = por %p981_p12, %p980_p11 }
 0x1e9   : > { %p983_p0 = pnand %p982_p13, %p976_p7 }
 0x1eb   : > { %986 = shalt.err (!%p983_p0)
}
 0x1ec   : > { %s1042_s18 = smov 256   ;;  %s1043_s20 = smov 512  }
 0x1ed   : > { %s1044_s23 = smov 16  }
 0x1ee   : > { %897 = dma.vmem_to_hbm [thread:$0]  (%p1100_p4), %s1244_s25, 4096, %s1242_s28, %s1250_s29, %s1042_s18, %s1043_s20, %s1044_s23  }
 0x1ef PF: > { %p903_p1 = scmp.ge.s32.totalorder %s1037_s14, 2  ;;  %s746_s24 = sand.u32 1, %s1017_s9  }
 0x1f0   : > { %s747_s26 = scalar_lea.sflag [#allocation4], %s746_s24 }
 0x1f1   : > { %p900_p2 = pnand %p903_p1, %p1107_p8 }
 0x1f3   : > { %1012 = dma.done.wait (!%p900_p2), %s747_s26, 4096  }
 0x1f4   : > { %1014 = vsyncadd (!%p900_p2), %s747_s26, 4294963200  ;;  %s15_s14 = sadd.s32 1, %s1037_s14   ;;  %s1301_s9 = smov %s1021_s10 }
 0x1f5   : > { %p12_p3 = scmp.ge.s32.totalorder %s15_s14, 4   ;;  %s1302_s10 = smov %s1025_s11 }
 0x1f6   : > { %s1303_s11 = smov %s1113_s22  ;;  %s1304_s12 = smov %s1033_s13 }
 0x1f7   : > { %s1305_s13 = smov %s1307_s17  ;;  %14 = sbr.rel (!%p12_p3) target bundleno = 4 (0x4), region = 70 }
 0x1fe   :  { %752 = vsyncpa [#allocation4], 1 }
 0x1ff   :  { %754 = vsyncpa [#allocation4 + $0x1], 1 }

</bundles_post_ra>
